<compile_context>
chip_gen: v7x
topology: tpu7x:2x2x1
jax: 0.10.0
libtpu: 0.0.40
codegen_flags: <defaults>
</compile_context>

<pallas_src>
import jax
import jax.numpy as jnp
from jax import lax
from jax.experimental import pallas as pl
from jax.experimental.pallas import tpu as pltpu


def _round_up(x, m):
    return ((x + m - 1) // m) * m


def _linear_kernel(x_ref, w_ref, b_ref, o_ref):
    # x_ref: [TB, K]          w_ref: [K, N_pad] (pre-transposed, pre-cast)
    # b_ref: [1, N_pad] f32   o_ref: [TB, N_pad]
    x = x_ref[...]
    if x.dtype != w_ref.dtype:
        x = x.astype(w_ref.dtype)          # only happens on the opt-in bf16 path
    acc = lax.dot_general(
        x, w_ref[...],
        dimension_numbers=(((1,), (0,)), ((), ())),
        preferred_element_type=jnp.float32,
    )
    # Bias add in f32 (v5e VPU has no bf16), single cast on store.
    o_ref[...] = (acc + b_ref[...]).astype(o_ref.dtype)


def prepare_classifier_params(weight, bias, *, compute_dtype=jnp.float32):
    """One-time parameter prep (call once at init, reuse every forward).

    weight: [N, K] (PyTorch nn.Linear layout), bias: [N].
    Returns (w_t [K, N_pad] compute_dtype, b_p [1, N_pad] f32).
    Padded columns are exactly zero, so slicing the output [:, :N] is exact.
    """
    N, K = weight.shape
    n_pad = max(128, _round_up(N, 128))
    w_t = jnp.zeros((K, n_pad), compute_dtype).at[:, :N].set(
        weight.T.astype(compute_dtype))
    b_p = jnp.zeros((1, n_pad), jnp.float32).at[0, :N].set(
        bias.astype(jnp.float32))
    return w_t, b_p


def classifier_forward(x, w_t, b_p, n_out, *, block_b=1024,
                       vmem_budget_bytes=32 * 1024 * 1024):
    """x: [B, K] f32; (w_t, b_p) from prepare_classifier_params; n_out = out_channels."""
    B, K = x.shape
    n_pad = w_t.shape[1]

    # ---- batch tile: multiple of 8, >=2 grid steps for mid-size B (v7x megacore),
    # ---- capped by a per-generation VMEM budget (binding on v7x's 64 MiB).
    block_b = max(8, _round_up(block_b, 8))
    fixed_bytes = 2 * K * n_pad * w_t.dtype.itemsize + 2 * n_pad * 4   # resident w/b (dbl-buf)
    per_row_bytes = 2 * K * x.dtype.itemsize + 2 * n_pad * 4           # dbl-buffered x + out
    tb_max = max(8, ((vmem_budget_bytes - fixed_bytes) // per_row_bytes) // 8 * 8)

    if B <= 8:
        tb = B                                   # single tiny tile, block == full dim
    elif B > block_b:
        tb = min(block_b, tb_max)
    else:
        # split batch in two so both v7x TensorCores get work
        tb = min(block_b, _round_up(pl.cdiv(B, 2), 8), tb_max)

    grid = (pl.cdiv(B, tb),)

    cost = pl.CostEstimate(
        flops=2 * B * K * n_pad,
        transcendentals=0,
        bytes_accessed=(B * K * x.dtype.itemsize
                        + K * n_pad * w_t.dtype.itemsize
                        + n_pad * 4
                        + B * n_pad * 4),
    )

    out_padded = pl.pallas_call(
        _linear_kernel,
        out_shape=jax.ShapeDtypeStruct((B, n_pad), x.dtype),
        grid=grid,
        in_specs=[
            pl.BlockSpec((tb, K), lambda i: (i, 0)),      # x tile marches over B
            pl.BlockSpec((K, n_pad), lambda i: (0, 0)),   # weight resident across steps
            pl.BlockSpec((1, n_pad), lambda i: (0, 0)),   # bias resident across steps
        ],
        out_specs=pl.BlockSpec((tb, n_pad), lambda i: (i, 0)),
        compiler_params=pltpu.CompilerParams(
            dimension_semantics=("parallel",),            # shard batch across v7x 2 TCs
            vmem_limit_bytes=48 * 1024 * 1024,
        ),
        cost_estimate=cost,
    )(x, w_t, b_p)

    return out_padded[:, :n_out]


if __name__ == "__main__":
    IN_CHANNELS = 1024   # module default
    OUT_CHANNELS = 2     # module default
    BATCH = 16           # small batch; exercises the 2-grid-step path

    key = jax.random.PRNGKey(0)
    kx, kw, kb = jax.random.split(key, 3)

    # Deterministic synthetic parameters (PyTorch Linear shapes: W [out,in], b [out])
    bound = 1.0 / (IN_CHANNELS ** 0.5)
    weight = jax.random.uniform(
        kw, (OUT_CHANNELS, IN_CHANNELS), jnp.float32, -bound, bound)
    bias = jax.random.uniform(
        kb, (OUT_CHANNELS,), jnp.float32, -bound, bound)

    x = jax.random.normal(kx, (BATCH, IN_CHANNELS), jnp.float32)

    # One-time prep (padding + transpose hoisted out of the forward path).
    w_t, b_p = prepare_classifier_params(weight, bias)   # exact f32 path

    out = classifier_forward(x, w_t, b_p, OUT_CHANNELS)
    out = jax.block_until_ready(out)
    assert out.shape == (BATCH, OUT_CHANNELS), out.shape

    # Reference: torch.nn.Linear semantics (f32).
    ref = x @ weight.T + bias
    assert jnp.allclose(out, ref, atol=1e-2, rtol=1e-2), "mismatch vs f32 nn.Linear ref"

    print("KERNEL_OK")
</pallas_src>

<mosaic_0001>
module attributes {stable_mosaic.version = 11 : i64} {
  func.func @_linear_kernel(%arg0: i32, %arg1: memref<8x1024xf32, #tpu.memory_space<vmem>>, %arg2: memref<1024x128xf32, #tpu.memory_space<vmem>>, %arg3: memref<1x128xf32, #tpu.memory_space<vmem>>, %arg4: memref<8x128xf32, #tpu.memory_space<vmem>>) attributes {dimension_semantics = [#tpu.dimension_semantics<parallel>], iteration_bounds = array<i64: 2>, scalar_prefetch = 0 : i64, scratch_operands = 0 : i64, tpu.core_type = #tpu.core_type<tc>, window_params = [{transform_indices = @transform_0, window_bounds = array<i64: 8, 1024>}, {pipeline_mode = #tpu.pipeline_mode<synchronous>, transform_indices = @transform_1, window_bounds = array<i64: 1024, 128>}, {pipeline_mode = #tpu.pipeline_mode<synchronous>, transform_indices = @transform_2, window_bounds = array<i64: 1, 128>}, {transform_indices = @transform_3, window_bounds = array<i64: 8, 128>}]} {
    %c0 = arith.constant 0 : index
    %c0_0 = arith.constant 0 : index
    %0 = vector.load %arg1[%c0, %c0_0] : memref<8x1024xf32, #tpu.memory_space<vmem>>, vector<8x1024xf32>
    %c0_1 = arith.constant 0 : index
    %c0_2 = arith.constant 0 : index
    %1 = vector.load %arg2[%c0_1, %c0_2] : memref<1024x128xf32, #tpu.memory_space<vmem>>, vector<1024x128xf32>
    %cst = arith.constant dense<0.000000e+00> : vector<8x128xf32>
    %2 = tpu.matmul %0, %1, %cst {dimension_numbers = #tpu.dot_dimension_numbers<[1], [0], [0], [1], [0, 0, 1, 1], [], []>} : vector<8x1024xf32>, vector<1024x128xf32>, vector<8x128xf32> -> vector<8x128xf32>
    %c0_3 = arith.constant 0 : index
    %c0_4 = arith.constant 0 : index
    %3 = vector.load %arg3[%c0_3, %c0_4] : memref<1x128xf32, #tpu.memory_space<vmem>>, vector<1x128xf32>
    %4 = vector.broadcast %3 : vector<1x128xf32> to vector<8x128xf32>
    %5 = arith.addf %2, %4 : vector<8x128xf32>
    %c0_5 = arith.constant 0 : index
    %c0_6 = arith.constant 0 : index
    %6 = vector.load %arg4[%c0_5, %c0_6] : memref<8x128xf32, #tpu.memory_space<vmem>>, vector<8x128xf32>
    tpu.vector_store %arg4[%c0_5, %c0_6], %5 {strides = array<i32>} : memref<8x128xf32, #tpu.memory_space<vmem>>, vector<8x128xf32>,
    return
  }
  func.func @transform_0(%arg0: i32) -> (i32, i32) {
    %c0_i32 = arith.constant 0 : i32
    %c0_i32_0 = arith.constant 0 : i32
    return %arg0, %c0_i32 : i32, i32
  }
  func.func @transform_1(%arg0: i32) -> (i32, i32) {
    %c0_i32 = arith.constant 0 : i32
    %c0_i32_0 = arith.constant 0 : i32
    %c0_i32_1 = arith.constant 0 : i32
    return %c0_i32, %c0_i32_0 : i32, i32
  }
  func.func @transform_2(%arg0: i32) -> (i32, i32) {
    %c0_i32 = arith.constant 0 : i32
    %c0_i32_0 = arith.constant 0 : i32
    %c0_i32_1 = arith.constant 0 : i32
    return %c0_i32, %c0_i32_0 : i32, i32
  }
  func.func @transform_3(%arg0: i32) -> (i32, i32) {
    %c0_i32 = arith.constant 0 : i32
    %c0_i32_0 = arith.constant 0 : i32
    return %arg0, %c0_i32 : i32, i32
  }
}

</mosaic_0001>

<bundles_post_ra>
// kernel: tpu_custom_call.1
= control target key start
LH: loop header
LB: loop body
LE: loop exit
PB: predicated region body
PF: predicated region fallthrough
CT: control target
= control target key end

     0   :  { %8 = vsyncpa [#allocation3], 0  ;;  %s1429_s0 = inlined_call_operand.hbm [shape: f32[16,1024], index: 0, kind: input, shape index: {}]   ;;  %s1430_s1 = inlined_call_operand.hbm [shape: f32[1024,128], index: 1, kind: input, shape index: {}]   ;;  %s1431_s2 = inlined_call_operand.vmem [shape: f32[1,128], index: 2, kind: input, shape index: {}]   ;;  %s1432_s3 = inlined_call_operand.hbm [shape: f32[16,128], index: 3, kind: output, shape index: {}]  }
   0x1   :  { %10 = vsyncpa [#allocation3 + $0x1], 0 }
   0x2   :  { %11 = vsyncpa [#allocation6], 0 }
   0x3   :  { %12 = vsyncpa [#allocation4], 0 }
   0x4   :  { %14 = vsyncpa [#allocation4 + $0x1], 0  ;;  %s1219_s12 = smov 0   ;;  %s1221_s13 = smov 0  }
   0x5   :  { %s1223_s14 = smov 0   ;;  %s1225_s15 = smov 0  }
   0x6 LB: > { %s1240_s16 = sadd.s32 4294967295, %s1192_s15   ;;  %s720_s17 = sadd.s32 4294967294, %s1192_s15   ;;  %s1192_s15 = sphi %s1225_s15, %s1452_s15   ;;  %s1188_s14 = sphi %s1223_s14, %s1451_s14   ;;  %s1184_s13 = sphi %s1221_s13, %s1450_s13   ;;  %s1180_s12 = sphi %s1219_s12, %s1449_s12  }
   0x7   : > { %p40_p0 = scmp.ne.s32.totalorder %s1184_s13, %s1180_s12  ;;  %p1433_p1 = scmp.eq.s32.totalorder %s1240_s16, 0 }
   0x8   : > { %p112_p3 = scmp.eq.s32.totalorder %s720_s17, 1  ;;  %p721_p5 = scmp.ge.s32.totalorder %s1192_s15, 1 }
   0x9   : > { %p1249_p4 = por %p1433_p1, %p40_p0  ;;  %p119_p7 = scmp.lt.s32.totalorder %s1192_s15, 3 }
   0xa   : > { %p1254_p6 = por %p112_p3, %p40_p0  ;;  %s1194_s21 = smov [#allocation5]  }
   0xb   : > { %s1436_s18 = scalar_select %p1249_p4, 1, 0 }
   0xc   : > { %s1437_s19 = scalar_select %p1254_p6, 1, 0 }
   0xd   : > { %p1259_p8 = pnand %p721_p5, %p119_p7  ;;  %s131_s22 = sshll.u32 %s1194_s21, 4  ;;  %s1263_s22 = int_to_ptr.vmem [resolvable:$true] %s131_s22 }
   0xe   : > { %s1275_s24 = sadd.s32 1, %s1192_s15   ;;  %s27_s25 = sadd.s32 1, %s1188_s14 }
   0xf   : > { %s1438_s20 = scalar_select %p1259_p8, 1, 0 }
  0x10   : > { %p1013_p9 = pneg %p1259_p8  ;;  %s24_s26 = ssub.s32 %s1192_s15, %s1275_s24 }
  0x11   : > { %s1064_s29 = scalar_lea.hbm %s1430_s1, 16384 }
  0x12   : > { %p1270_p11 = pnand %p1013_p9, %p1433_p1  ;;  %p1065_p12 = scmp.ne.s32.totalorder %s1430_s1, %s1064_s29 }
  0x13   : > { %p1071_p5 = scmp.lt.u32.totalorder %s1064_s29, %s1430_s1 }
  0x14   : > { %p1066_p13 = pneg %p1270_p11 }
  0x16   : > { %p1067_p0 = pnand %p1066_p13, %p1065_p12 }
  0x18   : > { %p1068_p3 = pneg %p1067_p0 }
  0x1a   : > { %p1073_p7 = pnand %p1071_p5, %p1068_p3 }
  0x1c   : > { %1076 = shalt.err (!%p1073_p7)
}
  0x1d   : > { %s1077_s7 = scalar_lea.vmem %s1263_s22, 16384  ;;  %p1085_p2 = scmp.lt.s32.totalorder %s1263_s22, %s1263_s22 }
  0x1e   : > { %p1078_p9 = scmp.ne.s32.totalorder %s1263_s22, %s1077_s7  ;;  %p1086_p6 = scmp.lt.s32.totalorder %s1077_s7, %s1077_s7 }
  0x20   : > { %p1080_p10 = pnand %p1078_p9, %p1066_p13  ;;  %p1087_p4 = por %p1086_p6, %p1085_p2 }
  0x22   : > { %p1081_p1 = pneg %p1080_p10 }
  0x24   : > { %p1088_p8 = pnand %p1087_p4, %p1081_p1 }
  0x26   : > { %1091 = shalt.err (!%p1088_p8)
}
  0x27   : > { %s1195_s8 = smov 128   ;;  %s1196_s9 = smov 8  }
  0x28   : > { %1016 = dma.hbm_to_vmem [thread:$0]  (!%p1270_p11), %s1430_s1, 16384, %s1263_s22, [#allocation6], %s1195_s8, %s1195_s8, %s1196_s9  }
  0x29   : > { %p25_p2 = scmp.eq.s32.totalorder %s24_s26, 0  ;;  %p34_p1 = scmp.ne.s32.totalorder %s1188_s14, %s1184_s13 }
  0x2a   : > { %p35_p4 = scmp.eq.s32.totalorder %s1192_s15, 0  ;;  %p1026_p6 = scmp.lt.s32.totalorder %s1192_s15, 2 }
  0x2b   : > { %s1306_s17 = scalar_select %p25_p2, %s1188_s14, %s27_s25  }
  0x2c   : > { %p36_p8 = por %p35_p4, %p34_p1  ;;  %p1440_p10 = scmp.eq.s32.totalorder %s1240_s16, 1 }
  0x2d   : > { %s148_s27 = sand.u32 1, %s1188_s14   ;;  %s736_s28 = sshll.u32 %s1192_s15, 10 }
  0x2e   : > { %p1310_p12 = por %p1440_p10, %p34_p1  ;;  %s724_s29 = sshll.u32 %s148_s27, 6 }
  0x2f   : > { %s1319_s4 = scalar_lea.hbm %s1429_s0, %s736_s28  ;;  %s152_s22 = scalar_lea.vmem [#allocation2], %s724_s29 }
  0x30   : > { %s160_s25 = sshll.u32 %s152_s22, 4  ;;  %p1321_p11 = pnand %p1026_p6, %p36_p8  ;;  %s1325_s25 = int_to_ptr.vmem [resolvable:$true] %s160_s25 }
  0x31   : > { %s149_s5 = scalar_lea.sflag [#allocation3], %s148_s27  ;;  %s1092_s6 = scalar_lea.hbm %s1319_s4, 1024 }
  0x32   : > { %p1093_p13 = scmp.ne.s32.totalorder %s1319_s4, %s1092_s6  ;;  %p1094_p0 = pneg %p1321_p11 }
  0x33   : > { %s1097_s9 = scalar_lea.hbm %s1429_s0, 2048  ;;  %p1098_p7 = scmp.lt.u32.totalorder %s1319_s4, %s1429_s0 }
  0x34   : > { %p1095_p3 = pnand %p1094_p0, %p1093_p13  ;;  %p1099_p9 = scmp.lt.u32.totalorder %s1097_s9, %s1092_s6 }
  0x35   : > { %p1101_p1 = scmp.lt.u32.totalorder %s1092_s6, %s1319_s4 }
  0x36   : > { %p1096_p5 = pneg %p1095_p3  ;;  %p1100_p2 = por %p1099_p9, %p1098_p7 }
  0x38   : > { %p1102_p4 = por %p1101_p1, %p1100_p2 }
  0x3a   : > { %p1103_p6 = pnand %p1102_p4, %p1096_p5 }
  0x3c   : > { %1106 = shalt.err (!%p1103_p6)
}
  0x3d   : > { %s1107_s27 = scalar_lea.vmem %s1325_s25, 1024  ;;  %s1197_s28 = smov [#allocation2]  }
  0x3e   : > { %p1108_p8 = scmp.ne.s32.totalorder %s1325_s25, %s1107_s27  ;;  %s1112_s29 = sshll.u32 %s1197_s28, 4  ;;  %s1113_s29 = int_to_ptr.vmem [resolvable:$false] %s1112_s29 }
  0x3f   : > { %s1114_s23 = scalar_lea.vmem %s1113_s29, 2048  ;;  %p1115_p3 = scmp.lt.s32.totalorder %s1325_s25, %s1113_s29 }
  0x40   : > { %p1110_p10 = pnand %p1108_p8, %p1094_p0  ;;  %p1116_p7 = scmp.lt.s32.totalorder %s1114_s23, %s1107_s27 }
  0x42   : > { %p1111_p13 = pneg %p1110_p10  ;;  %p1117_p9 = por %p1116_p7, %p1115_p3 }
  0x44   : > { %p1118_p2 = pnand %p1117_p9, %p1111_p13 }
  0x46   : > { %1121 = shalt.err (!%p1118_p2)
}
  0x47   : > { %1020 = dma.hbm_to_vmem [thread:$0]  (!%p1321_p11), %s1319_s4, 1024, %s1325_s25, %s149_s5  }
  0x48   : > { %p1443_p5 = scmp.ne.s32.totalorder %s1438_s20, 0 }
  0x49   : > { %s1355_s30 = sand.u32 (!%p1443_p5), 1, %s1184_s13   ;;  %p1444_p0 = scmp.ne.s32.totalorder (!%p1443_p5), %s1436_s18, 0 }
  0x4a   : > { %169 = sbr.rel (%p1443_p5) target bundleno = 385 (0x181), region = 32  ;;  %s728_s22 = sshll.u32 (!%p1443_p5), %s1355_s30, 6 }
  0x4b   : > { %s172_s6 = scalar_lea.sflag (!%p1443_p5), [#allocation3], %s1355_s30  ;;  %s1359_s7 = scalar_lea.vmem (!%p1443_p5), [#allocation2], %s728_s22 }
  0x51   : > { %1167 = dma.done.wait (%p1444_p0), %s172_s6, 1024  }
  0x52   : > { %1169 = vsyncadd (%p1444_p0), %s172_s6, 4294966272  ;;  %p1445_p11 = scmp.eq.s32.totalorder %s1240_s16, 0 }
  0x54   : > { %1171 = dma.done.wait (%p1445_p11), [#allocation6], 16384   ;;  %p1446_p1 = pmov %p1445_p11 }
  0x55   : > { %v226_v0 = vld [vmem:[#allocation5 + $0x80] sm:$0xff]  ;;  %v227_v1 = vld [vmem:[#allocation5 + $0x88] sm:$0xff]  ;;  %v228_v11 = vld [vmem:[#allocation5 + $0x90] sm:$0xff]  ;;  %s730_s4 = sshll.u32 %s1355_s30, 3  ;;  %s733_s25 = sshll.u32 %s1240_s16, 7 }
  0x56   : > { %1173 = vsyncadd (%p1446_p1), [#allocation6], 4294950912  ;;  %v210_v2 = vld [vmem:[#allocation5] sm:$0xff]  ;;  %v877_v3 = vpack.c.bf16 %v227_v1, %v226_v0  ;;  %v211_v4 = vld [vmem:[#allocation5 + $0x8] sm:$0xff]  ;;  %s201_s26 = scalar_lea.vmem [#allocation7], %s730_s4  ;;  %s1385_s10 = scalar_lea.hbm %s1432_s3, %s733_s25 }
  0x57   : > { %v258_v5 = vld [vmem:[#allocation5 + $0x180] sm:$0xff]  ;;  %v259_v6 = vld [vmem:[#allocation5 + $0x188] sm:$0xff]  ;;  %v879_v7 = vpack.c.bf16 %v211_v4, %v210_v2  ;;  %v229_v13 = vld [vmem:[#allocation5 + $0x98] sm:$0xff]  ;;  %s640_s5 = sshll.u32 %s201_s26, 4  ;;  %s627_s11 = scalar_lea.sflag [#allocation4], %s1355_s30  ;;  %s1387_s5 = int_to_ptr.vmem [resolvable:$true] %s640_s5 }
  0x58   : > { %v909_v8 = vpack.c.bf16 %v259_v6, %v258_v5  ;;  %v242_v9 = vld [vmem:[#allocation5 + $0x100] sm:$0xff]  ;;  %v243_v10 = vld [vmem:[#allocation5 + $0x108] sm:$0xff]  ;;  %878 = vmatprep.subr.bf16.mxu0 %v877_v3  ;;  %v212_v14 = vld [vmem:[#allocation5 + $0x10] sm:$0xff]  ;;  %v881_v16 = vpack.c.bf16 %v229_v13, %v228_v11  ;;  %s1122_s27 = scalar_lea.vmem %s1387_s5, 128  ;;  %s1198_s16 = smov [#allocation7]  }
  0x59   : > { %v911_v12 = vpack.c.bf16 %v243_v10, %v242_v9  ;;  %v213_v15 = vld [vmem:[#allocation5 + $0x18] sm:$0xff]  ;;  %880 = vmatpush3.bf16.msra.mxu0 %v879_v7  ;;  %v260_v18 = vld [vmem:[#allocation5 + $0x190] sm:$0xff]  ;;  %v230_v23 = vld [vmem:[#allocation5 + $0xa0] sm:$0xff]  ;;  %p1123_p4 = scmp.ne.s32.totalorder %s1387_s5, %s1122_s27  ;;  %s1126_s28 = sshll.u32 %s1198_s16, 4  ;;  %s1127_s28 = int_to_ptr.vmem [resolvable:$false] %s1126_s28 }
  0x5a   : > { %910 = vmatprep.subr.bf16.mxu1 %v909_v8  ;;  %v883_v17 = vpack.c.bf16 %v213_v15, %v212_v14  ;;  %v261_v19 = vld [vmem:[#allocation5 + $0x198] sm:$0xff]  ;;  %v244_v20 = vld [vmem:[#allocation5 + $0x110] sm:$0xff]  ;;  %v231_v24 = vld [vmem:[#allocation5 + $0xa8] sm:$0xff]  ;;  %882 = vmatprep.subr.bf16.mxu0 %v881_v16  ;;  %s1128_s29 = scalar_lea.vmem %s1127_s28, 256  ;;  %p1129_p10 = scmp.lt.s32.totalorder %s1387_s5, %s1127_s28 }
  0x5b   : > { %912 = vmatpush3.bf16.msra.mxu1 %v911_v12  ;;  %v913_v21 = vpack.c.bf16 %v261_v19, %v260_v18  ;;  %v245_v22 = vld [vmem:[#allocation5 + $0x118] sm:$0xff]  ;;  %v885_v26 = vpack.c.bf16 %v231_v24, %v230_v23  ;;  %v214_v27 = vld [vmem:[#allocation5 + $0x20] sm:$0xff]  ;;  %v215_v28 = vld [vmem:[#allocation5 + $0x28] sm:$0xff]  ;;  %p1124_p6 = pnand %p1123_p4, %p1310_p12  ;;  %p1130_p13 = scmp.lt.s32.totalorder %s1128_s29, %s1122_s27 }
  0x5c   : > { %v915_v25 = vpack.c.bf16 %v245_v22, %v244_v20  ;;  %v262_v29 = vld [vmem:[#allocation5 + $0x1a0] sm:$0xff]  ;;  %v263_v30 = vld [vmem:[#allocation5 + $0x1a8] sm:$0xff]  ;;  %v887_v33 = vpack.c.bf16 %v215_v28, %v214_v27  ;;  %v232_v35 = vld [vmem:[#allocation5 + $0xb0] sm:$0xff] }
  0x5d   : > { %914 = vmatprep.subr.bf16.mxu1 %v913_v21  ;;  %v246_v31 = vld [vmem:[#allocation5 + $0x120] sm:$0xff]  ;;  %v247_v32 = vld [vmem:[#allocation5 + $0x128] sm:$0xff]  ;;  %884 = vmatpush3.bf16.msra.mxu0 %v883_v17  ;;  %v917_v34 = vpack.c.bf16 %v263_v30, %v262_v29  ;;  %v233_v36 = vld [vmem:[#allocation5 + $0xb8] sm:$0xff]  ;;  %p1125_p8 = pneg %p1124_p6  ;;  %p1131_p3 = por %p1130_p13, %p1129_p10 }
  0x5e   : > { %v216_v37 = vld [vmem:[#allocation5 + $0x30] sm:$0xff]  ;;  %886 = vmatprep.subr.bf16.mxu0 %v885_v26  ;;  %v919_v38 = vpack.c.bf16 %v247_v32, %v246_v31  ;;  %v889_v39 = vpack.c.bf16 %v233_v36, %v232_v35  ;;  %v217_v40 = vld [vmem:[#allocation5 + $0x38] sm:$0xff]  ;;  %v234_v46 = vld [vmem:[#allocation5 + $0xc0] sm:$0xff] }
  0x5f   : > { %916 = vmatpush3.bf16.msra.mxu1 %v915_v25  ;;  %v264_v41 = vld [vmem:[#allocation5 + $0x1b0] sm:$0xff]  ;;  %v265_v42 = vld [vmem:[#allocation5 + $0x1b8] sm:$0xff]  ;;  %v235_v47 = vld [vmem:[#allocation5 + $0xc8] sm:$0xff]  ;;  %v891_v48 = vpack.c.bf16 %v217_v40, %v216_v37  ;;  %p1132_p7 = pnand %p1131_p3, %p1125_p8 }
  0x60   : > { %918 = vmatprep.subr.bf16.mxu1 %v917_v34  ;;  %v921_v43 = vpack.c.bf16 %v265_v42, %v264_v41  ;;  %v248_v44 = vld [vmem:[#allocation5 + $0x130] sm:$0xff]  ;;  %v249_v45 = vld [vmem:[#allocation5 + $0x138] sm:$0xff]  ;;  %v266_v49 = vld [vmem:[#allocation5 + $0x1c0] sm:$0xff]  ;;  %v893_v52 = vpack.c.bf16 %v235_v47, %v234_v46 }
  0x61   : > { %888 = vmatpush3.bf16.msra.mxu0 %v887_v33  ;;  %v267_v50 = vld [vmem:[#allocation5 + $0x1c8] sm:$0xff]  ;;  %v923_v51 = vpack.c.bf16 %v249_v45, %v248_v44  ;;  %v218_v53 = vld [vmem:[#allocation5 + $0x40] sm:$0xff]  ;;  %v236_v58 = vld [vmem:[#allocation5 + $0xd0] sm:$0xff] }
  0x62   : > { %890 = vmatprep.subr.bf16.mxu0 %v889_v39  ;;  %v219_v54 = vld [vmem:[#allocation5 + $0x48] sm:$0xff]  ;;  %v250_v55 = vld [vmem:[#allocation5 + $0x140] sm:$0xff]  ;;  %v925_v56 = vpack.c.bf16 %v267_v50, %v266_v49  ;;  %v237_v59 = vld [vmem:[#allocation5 + $0xd8] sm:$0xff] }
  0x63   : > { %920 = vmatpush3.bf16.msra.mxu1 %v919_v38  ;;  %v251_v57 = vld [vmem:[#allocation5 + $0x148] sm:$0xff]  ;;  %v268_v60 = vld [vmem:[#allocation5 + $0x1d0] sm:$0xff]  ;;  %v269_v61 = vld [vmem:[#allocation5 + $0x1d8] sm:$0xff]  ;;  %v895_v62 = vpack.c.bf16 %v219_v54, %v218_v53  ;;  %v897_v0 = vpack.c.bf16 %v237_v59, %v236_v58 }
  0x64   : > { %922 = vmatprep.subr.bf16.mxu1 %v921_v43  ;;  %v927_v63 = vpack.c.bf16 %v251_v57, %v250_v55  ;;  %v220_v1 = vld [vmem:[#allocation5 + $0x50] sm:$0xff]  ;;  %v221_v2 = vld [vmem:[#allocation5 + $0x58] sm:$0xff]  ;;  %v929_v4 = vpack.c.bf16 %v269_v61, %v268_v60  ;;  %v238_v6 = vld [vmem:[#allocation5 + $0xe0] sm:$0xff] }
  0x65   : > { %892 = vmatpush3.bf16.msra.mxu0 %v891_v48  ;;  %v252_v3 = vld [vmem:[#allocation5 + $0x150] sm:$0xff]  ;;  %v253_v5 = vld [vmem:[#allocation5 + $0x158] sm:$0xff]  ;;  %v239_v7 = vld [vmem:[#allocation5 + $0xe8] sm:$0xff]  ;;  %v899_v10 = vpack.c.bf16 %v221_v2, %v220_v1 }
  0x66   : > { %894 = vmatprep.subr.bf16.mxu0 %v893_v52  ;;  %v270_v8 = vld [vmem:[#allocation5 + $0x1e0] sm:$0xff]  ;;  %v271_v9 = vld [vmem:[#allocation5 + $0x1e8] sm:$0xff]  ;;  %v931_v13 = vpack.c.bf16 %v253_v5, %v252_v3  ;;  %v901_v14 = vpack.c.bf16 %v239_v7, %v238_v6  ;;  %v240_v19 = vld [vmem:[#allocation5 + $0xf0] sm:$0xff] }
  0x67   : > { %924 = vmatpush3.bf16.msra.mxu1 %v923_v51  ;;  %v222_v11 = vld [vmem:[#allocation5 + $0x60] sm:$0xff]  ;;  %v223_v12 = vld [vmem:[#allocation5 + $0x68] sm:$0xff]  ;;  %v933_v18 = vpack.c.bf16 %v271_v9, %v270_v8  ;;  %v241_v20 = vld [vmem:[#allocation5 + $0xf8] sm:$0xff] }
  0x68   : > { %926 = vmatprep.subr.bf16.mxu1 %v925_v56  ;;  %v254_v15 = vld [vmem:[#allocation5 + $0x160] sm:$0xff]  ;;  %v255_v16 = vld [vmem:[#allocation5 + $0x168] sm:$0xff]  ;;  %v205_v21 = vld [vmem:[%s1359_s7 + $0x18] sm:$0xff]  ;;  %v903_v24 = vpack.c.bf16 %v223_v12, %v222_v11  ;;  %v905_v26 = vpack.c.bf16 %v241_v20, %v240_v19 }
  0x69   : > { %896 = vmatpush3.bf16.msra.mxu0 %v895_v62  ;;  %v203_v17 = vld [vmem:[%s1359_s7 + $0x8] sm:$0xff]  ;;  %v272_v22 = vld [vmem:[#allocation5 + $0x1f0] sm:$0xff]  ;;  %v273_v23 = vld [vmem:[#allocation5 + $0x1f8] sm:$0xff]  ;;  %479 = vmatprep.mubr.f32.mxu1 %v205_v21  ;;  %v935_v25 = vpack.c.bf16 %v255_v16, %v254_v15 }
  0x6a   : > { %898 = vmatprep.subr.bf16.mxu0 %v897_v0  ;;  %409 = vmatprep.mubr.f32.mxu0 %v203_v17  ;;  %v224_v27 = vld [vmem:[#allocation5 + $0x70] sm:$0xff]  ;;  %v225_v28 = vld [vmem:[#allocation5 + $0x78] sm:$0xff]  ;;  %v937_v30 = vpack.c.bf16 %v273_v23, %v272_v22  ;;  %v290_v32 = vld [vmem:[#allocation5 + $0x280] sm:$0xff] }
  0x6b   : > { %928 = vmatpush3.bf16.msra.mxu1 %v927_v63  ;;  %v256_v29 = vld [vmem:[#allocation5 + $0x170] sm:$0xff]  ;;  %v257_v31 = vld [vmem:[#allocation5 + $0x178] sm:$0xff]  ;;  %v291_v33 = vld [vmem:[#allocation5 + $0x288] sm:$0xff]  ;;  %v907_v36 = vpack.c.bf16 %v225_v28, %v224_v27 }
  0x6c   : > { %930 = vmatprep.subr.bf16.mxu1 %v929_v4  ;;  %v322_v34 = vld [vmem:[#allocation5 + $0x380] sm:$0xff]  ;;  %v323_v35 = vld [vmem:[#allocation5 + $0x388] sm:$0xff]  ;;  %v939_v37 = vpack.c.bf16 %v257_v31, %v256_v29  ;;  %v941_v38 = vpack.c.bf16 %v291_v33, %v290_v32  ;;  %v292_v44 = vld [vmem:[#allocation5 + $0x290] sm:$0xff] }
  0x6d   : > { %900 = vmatpush3.bf16.msra.mxu0 %v899_v10  ;;  %v274_v39 = vld [vmem:[#allocation5 + $0x200] sm:$0xff]  ;;  %v275_v40 = vld [vmem:[#allocation5 + $0x208] sm:$0xff]  ;;  %v973_v42 = vpack.c.bf16 %v323_v35, %v322_v34  ;;  %v293_v45 = vld [vmem:[#allocation5 + $0x298] sm:$0xff] }
  0x6e   : > { %902 = vmatprep.subr.bf16.mxu0 %v901_v14  ;;  %v306_v41 = vld [vmem:[#allocation5 + $0x300] sm:$0xff]  ;;  %v307_v43 = vld [vmem:[#allocation5 + $0x308] sm:$0xff]  ;;  %v324_v46 = vld [vmem:[#allocation5 + $0x390] sm:$0xff]  ;;  %v943_v49 = vpack.c.bf16 %v275_v40, %v274_v39  ;;  %v945_v52 = vpack.c.bf16 %v293_v45, %v292_v44 }
  0x6f   : > { %932 = vmatpush3.bf16.msra.mxu1 %v931_v13  ;;  %v325_v47 = vld [vmem:[#allocation5 + $0x398] sm:$0xff]  ;;  %v202_v48 = vld [vmem:[%s1359_s7] sm:$0xff]  ;;  %v204_v50 = vld [vmem:[%s1359_s7 + $0x10] sm:$0xff]  ;;  %v975_v51 = vpack.c.bf16 %v307_v43, %v306_v41 }
  0x70   : > { %934 = vmatprep.subr.bf16.mxu1 %v933_v18  ;;  %v276_v53 = vld [vmem:[#allocation5 + $0x210] sm:$0xff]  ;;  %v277_v54 = vld [vmem:[#allocation5 + $0x218] sm:$0xff]  ;;  %v977_v56 = vpack.c.bf16 %v325_v47, %v324_v46  ;;  %v294_v58 = vld [vmem:[#allocation5 + $0x2a0] sm:$0xff] }
  0x71   : > { %904 = vmatpush3.bf16.msra.mxu0 %v903_v24  ;;  %v308_v55 = vld [vmem:[#allocation5 + $0x310] sm:$0xff]  ;;  %v309_v57 = vld [vmem:[#allocation5 + $0x318] sm:$0xff]  ;;  %v295_v59 = vld [vmem:[#allocation5 + $0x2a8] sm:$0xff]  ;;  %v947_v62 = vpack.c.bf16 %v277_v54, %v276_v53 }
  0x72   : > { %906 = vmatprep.subr.bf16.mxu0 %v905_v26  ;;  %v326_v60 = vld [vmem:[#allocation5 + $0x3a0] sm:$0xff]  ;;  %v327_v61 = vld [vmem:[#allocation5 + $0x3a8] sm:$0xff]  ;;  %v979_v63 = vpack.c.bf16 %v309_v57, %v308_v55  ;;  %v949_v0 = vpack.c.bf16 %v295_v59, %v294_v58  ;;  %v296_v6 = vld [vmem:[#allocation5 + $0x2b0] sm:$0xff] }
  0x73   : > { %936 = vmatpush3.bf16.msra.mxu1 %v935_v25  ;;  %v278_v1 = vld [vmem:[#allocation5 + $0x220] sm:$0xff]  ;;  %v279_v2 = vld [vmem:[#allocation5 + $0x228] sm:$0xff]  ;;  %v981_v4 = vpack.c.bf16 %v327_v61, %v326_v60  ;;  %v297_v7 = vld [vmem:[#allocation5 + $0x2b8] sm:$0xff] }
  0x74   : > { %938 = vmatprep.subr.bf16.mxu1 %v937_v30  ;;  %v310_v3 = vld [vmem:[#allocation5 + $0x320] sm:$0xff]  ;;  %v311_v5 = vld [vmem:[#allocation5 + $0x328] sm:$0xff]  ;;  %v328_v8 = vld [vmem:[#allocation5 + $0x3b0] sm:$0xff]  ;;  %v951_v10 = vpack.c.bf16 %v279_v2, %v278_v1  ;;  %v953_v12 = vpack.c.bf16 %v297_v7, %v296_v6 }
  0x75   : > { %908 = vmatpush3.bf16.msra.mxu0 %v907_v36  ;;  %v329_v9 = vld [vmem:[#allocation5 + $0x3b8] sm:$0xff]  ;;  %v983_v11 = vpack.c.bf16 %v311_v5, %v310_v3  ;;  %v280_v13 = vld [vmem:[#allocation5 + $0x230] sm:$0xff]  ;;  %v298_v18 = vld [vmem:[#allocation5 + $0x2c0] sm:$0xff] }
  0x76   : > { %942 = vmatprep.subr.bf16.mxu0 %v941_v38  ;;  %v281_v14 = vld [vmem:[#allocation5 + $0x238] sm:$0xff]  ;;  %v312_v15 = vld [vmem:[#allocation5 + $0x330] sm:$0xff]  ;;  %v985_v16 = vpack.c.bf16 %v329_v9, %v328_v8  ;;  %v299_v19 = vld [vmem:[#allocation5 + $0x2c8] sm:$0xff] }
  0x77   : > { %940 = vmatpush3.bf16.msra.mxu1 %v939_v37  ;;  %v313_v17 = vld [vmem:[#allocation5 + $0x338] sm:$0xff]  ;;  %v330_v20 = vld [vmem:[#allocation5 + $0x3c0] sm:$0xff]  ;;  %v331_v21 = vld [vmem:[#allocation5 + $0x3c8] sm:$0xff]  ;;  %v955_v22 = vpack.c.bf16 %v281_v14, %v280_v13  ;;  %v957_v26 = vpack.c.bf16 %v299_v19, %v298_v18 }
  0x78   : > { %974 = vmatprep.subr.bf16.mxu1 %v973_v42  ;;  %410 = vmatmul.mubr.f32.vlgmr.msra.gmra.mrb[0].mxu0 %v202_v48  ;;  %v207_v23 = vld [vmem:[%s1359_s7 + $0x28] sm:$0xff]  ;;  %v209_v24 = vld [vmem:[%s1359_s7 + $0x38] sm:$0xff]  ;;  %v987_v25 = vpack.c.bf16 %v313_v17, %v312_v15  ;;  %v282_v27 = vld [vmem:[#allocation5 + $0x240] sm:$0xff]  ;;  %v989_v30 = vpack.c.bf16 %v331_v21, %v330_v20 }
  0x79   : > { %944 = vmatpush3.bf16.msra.mxu0 %v943_v49  ;;  %v283_v28 = vld [vmem:[#allocation5 + $0x248] sm:$0xff]  ;;  %v314_v29 = vld [vmem:[#allocation5 + $0x340] sm:$0xff]  ;;  %v300_v32 = vld [vmem:[#allocation5 + $0x2d0] sm:$0xff]  ;;  %549 = vmatprep.mubr.f32.mxu0 %v207_v23 }
  0x7a   : > { %480 = vmatmul.mubr.f32.vlgmr.msra.gmra.mrb[0].mxu1 %v204_v50  ;;  %946 = vmatprep.subr.bf16.mxu0 %v945_v52  ;;  %v315_v31 = vld [vmem:[#allocation5 + $0x348] sm:$0xff]  ;;  %v301_v33 = vld [vmem:[#allocation5 + $0x2d8] sm:$0xff]  ;;  %v332_v34 = vld [vmem:[#allocation5 + $0x3d0] sm:$0xff]  ;;  %v959_v36 = vpack.c.bf16 %v283_v28, %v282_v27 }
  0x7b   : > { %976 = vmatpush3.bf16.msra.mxu1 %v975_v51  ;;  %v333_v35 = vld [vmem:[#allocation5 + $0x3d8] sm:$0xff]  ;;  %619 = vmatprep.mubr.f32.mxu1 %v209_v24  ;;  %v991_v37 = vpack.c.bf16 %v315_v31, %v314_v29  ;;  %v961_v38 = vpack.c.bf16 %v301_v33, %v300_v32  ;;  %v284_v39 = vld [vmem:[#allocation5 + $0x250] sm:$0xff]  ;;  %v302_v44 = vld [vmem:[#allocation5 + $0x2e0] sm:$0xff] }
  0x7c   : > { %978 = vmatprep.subr.bf16.mxu1 %v977_v56  ;;  %v285_v40 = vld [vmem:[#allocation5 + $0x258] sm:$0xff]  ;;  %v316_v41 = vld [vmem:[#allocation5 + $0x350] sm:$0xff]  ;;  %v993_v42 = vpack.c.bf16 %v333_v35, %v332_v34  ;;  %v303_v45 = vld [vmem:[#allocation5 + $0x2e8] sm:$0xff] }
  0x7d   : > { %948 = vmatpush3.bf16.msra.mxu0 %v947_v62  ;;  %v317_v43 = vld [vmem:[#allocation5 + $0x358] sm:$0xff]  ;;  %v334_v46 = vld [vmem:[#allocation5 + $0x3e0] sm:$0xff]  ;;  %v335_v47 = vld [vmem:[#allocation5 + $0x3e8] sm:$0xff]  ;;  %v963_v48 = vpack.c.bf16 %v285_v40, %v284_v39  ;;  %v965_v50 = vpack.c.bf16 %v303_v45, %v302_v44 }
  0x7e   : > { %950 = vmatprep.subr.bf16.mxu0 %v949_v0  ;;  %v995_v49 = vpack.c.bf16 %v317_v43, %v316_v41  ;;  %v286_v51 = vld [vmem:[#allocation5 + $0x260] sm:$0xff]  ;;  %v287_v52 = vld [vmem:[#allocation5 + $0x268] sm:$0xff]  ;;  %v997_v54 = vpack.c.bf16 %v335_v47, %v334_v46  ;;  %v304_v56 = vld [vmem:[#allocation5 + $0x2f0] sm:$0xff] }
  0x7f   : > { %980 = vmatpush3.bf16.msra.mxu1 %v979_v63  ;;  %v318_v53 = vld [vmem:[#allocation5 + $0x360] sm:$0xff]  ;;  %v319_v55 = vld [vmem:[#allocation5 + $0x368] sm:$0xff]  ;;  %v305_v57 = vld [vmem:[#allocation5 + $0x2f8] sm:$0xff]  ;;  %v967_v60 = vpack.c.bf16 %v287_v52, %v286_v51 }
  0x80   : > { %982 = vmatprep.subr.bf16.mxu1 %v981_v4  ;;  %v336_v58 = vld [vmem:[#allocation5 + $0x3f0] sm:$0xff]  ;;  %v337_v59 = vld [vmem:[#allocation5 + $0x3f8] sm:$0xff]  ;;  %v999_v61 = vpack.c.bf16 %v319_v55, %v318_v53  ;;  %v969_v62 = vpack.c.bf16 %v305_v57, %v304_v56  ;;  %v206_v6 = vld [vmem:[%s1359_s7 + $0x20] sm:$0xff] }
  0x81   : > { %952 = vmatpush3.bf16.msra.mxu0 %v951_v10  ;;  %v288_v63 = vld [vmem:[#allocation5 + $0x270] sm:$0xff]  ;;  %v289_v0 = vld [vmem:[#allocation5 + $0x278] sm:$0xff]  ;;  %v1001_v1 = vpack.c.bf16 %v337_v59, %v336_v58  ;;  %v731_v9 = vld [vmem:[%s1431_s2] ss:$0 sm:$0xff] }
  0x82   : > { %954 = vmatprep.subr.bf16.mxu0 %v953_v12  ;;  %v320_v2 = vld [vmem:[#allocation5 + $0x370] sm:$0xff]  ;;  %v321_v3 = vld [vmem:[#allocation5 + $0x378] sm:$0xff]  ;;  %v971_v4 = vpack.c.bf16 %v289_v0, %v288_v63 }
  0x83   : > { %984 = vmatpush3.bf16.msra.mxu1 %v983_v11  ;;  %v1003_v5 = vpack.c.bf16 %v321_v3, %v320_v2  ;;  %v208_v7 = vld [vmem:[%s1359_s7 + $0x30] sm:$0xff] }
  0x84   : > { %986 = vmatprep.subr.bf16.mxu1 %v985_v16 }
  0x85   : > { %956 = vmatpush3.bf16.msra.mxu0 %v955_v22 }
  0x86   : > { %958 = vmatprep.subr.bf16.mxu0 %v957_v26 }
  0x87   : > { %988 = vmatpush3.bf16.msra.mxu1 %v987_v25 }
  0x88   : > { %990 = vmatprep.subr.bf16.mxu1 %v989_v30 }
  0x89   : > { %960 = vmatpush3.bf16.msra.mxu0 %v959_v36 }
  0x8a   : > { %962 = vmatprep.subr.bf16.mxu0 %v961_v38 }
  0x8b   : > { %992 = vmatpush3.bf16.msra.mxu1 %v991_v37 }
  0x8c   : > { %994 = vmatprep.subr.bf16.mxu1 %v993_v42 }
  0x8d   : > { %964 = vmatpush3.bf16.msra.mxu0 %v963_v48 }
  0x8e   : > { %966 = vmatprep.subr.bf16.mxu0 %v965_v50 }
  0x8f   : > { %996 = vmatpush3.bf16.msra.mxu1 %v995_v49 }
  0x90   : > { %998 = vmatprep.subr.bf16.mxu1 %v997_v54 }
  0x91   : > { %968 = vmatpush3.bf16.msra.mxu0 %v967_v60 }
  0x92   : > { %970 = vmatprep.subr.bf16.mxu0 %v969_v62 }
  0x93   : > { %1000 = vmatpush3.bf16.msra.mxu1 %v999_v61 }
  0x94   : > { %1002 = vmatprep.subr.bf16.mxu1 %v1001_v1 }
  0x95   : > { %972 = vmatpush3.bf16.msra.mxu0 %v971_v4 }
  0x97   : > { %1004 = vmatpush3.bf16.msra.mxu1 %v1003_v5 }
  0x98   : > { %550 = vmatmul.mubr.f32.vlgmr.msra.gmra.mrb[2].mxu0 %v206_v6 }
  0x9a   : > { %620 = vmatmul.mubr.f32.vlgmr.msra.gmra.mrb[2].mxu1 %v208_v7 }
 0x14b   : > { %v769_v8 = vpop.f32.mrb[0].mxu0 }
 0x14c   : > { %v770_v10 = vpop.f32.mrb[1].mxu0 }
 0x14d   : > { %v804_v11 = vpop.f32.mrb[0].mxu1  ;;  %v771_v12 = vadd.f32 %v770_v10, %v769_v8 }
 0x14e   : > { %v805_v13 = vpop.f32.mrb[1].mxu1 }
 0x14f   : > { %v806_v14 = vadd.f32 %v805_v13, %v804_v11  ;;  %v412_v15 = vadd.f32 %v771_v12, %v731_v9 }
 0x151   : > { %v482_v16 = vadd.f32 %v806_v14, %v412_v15 }
 0x16b   : > { %v839_v17 = vpop.f32.mrb[2].mxu0 }
 0x16c   : > { %v840_v18 = vpop.f32.mrb[3].mxu0 }
 0x16d   : > { %v874_v19 = vpop.f32.mrb[2].mxu1  ;;  %v841_v20 = vadd.f32 %v840_v18, %v839_v17 }
 0x16e   : > { %v875_v21 = vpop.f32.mrb[3].mxu1 }
 0x16f   : > { %v876_v22 = vadd.f32 %v875_v21, %v874_v19  ;;  %v552_v23 = vadd.f32 %v841_v20, %v482_v16 }
 0x171   : > { %v622_v24 = vadd.f32 %v876_v22, %v552_v23 }
 0x173   : > { %625 = vst [vmem:[%s201_s26] sm:$0xff] %v622_v24 }
 0x174   : > { %1135 = shalt.err (!%p1132_p7)
}
 0x175   : > { %s1136_s23 = scalar_lea.hbm %s1385_s10, 128  ;;  %s1140_s6 = scalar_lea.hbm %s1432_s3, 256 }
 0x176   : > { %p1137_p9 = scmp.ne.s32.totalorder %s1385_s10, %s1136_s23  ;;  %p1141_p0 = scmp.lt.u32.totalorder %s1385_s10, %s1432_s3 }
 0x177   : > { %p1142_p11 = scmp.lt.u32.totalorder %s1140_s6, %s1136_s23  ;;  %p1144_p4 = scmp.lt.u32.totalorder %s1136_s23, %s1385_s10 }
 0x178   : > { %p1138_p2 = pnand %p1137_p9, %p1310_p12 }
 0x179   : > { %p1143_p1 = por %p1142_p11, %p1141_p0 }
 0x17a   : > { %p1139_p5 = pneg %p1138_p2 }
 0x17b   : > { %p1145_p6 = por %p1144_p4, %p1143_p1 }
 0x17d   : > { %p1146_p8 = pnand %p1145_p6, %p1139_p5 }
 0x17f   : > { %1149 = shalt.err (!%p1146_p8)
}
 0x180   : > { %1011 = dma.vmem_to_hbm [thread:$0]  (%p1310_p12), %s1387_s5, 128, %s1385_s10, %s627_s11  }
 0x181 PF: > { %s652_s20 = sand.u32 1, %s1180_s12   ;;  %p1447_p10 = scmp.ne.s32.totalorder %s1437_s19, 0 }
 0x182   : > { %p1448_p13 = scmp.ge.s32.totalorder %s1192_s15, 2  ;;  %s653_s4 = scalar_lea.sflag [#allocation4], %s652_s20 }
 0x184   : > { %p1022_p3 = pnand %p1448_p13, %p1447_p10 }
 0x186   : > { %1175 = dma.done.wait (!%p1022_p3), %s653_s4, 128  }
 0x187   : > { %1177 = vsyncadd (!%p1022_p3), %s653_s4, 4294967168  ;;  %p17_p7 = scmp.ge.s32.totalorder %s1275_s24, 4   ;;  %s1449_s12 = smov %s1184_s13 }
 0x188   : > { %s1450_s13 = smov %s1188_s14  ;;  %s1451_s14 = smov %s1306_s17 }
 0x189   : > { %s1452_s15 = smov %s1275_s24  ;;  %19 = sbr.rel (!%p17_p7) target bundleno = 6 (0x6), region = 81 }
 0x190   :  { %658 = vsyncpa [#allocation3], 1 }
 0x191   :  { %660 = vsyncpa [#allocation3 + $0x1], 1 }
 0x192   :  { %661 = vsyncpa [#allocation6], 1 }
 0x193   :  { %662 = vsyncpa [#allocation4], 1 }
 0x194   :  { %664 = vsyncpa [#allocation4 + $0x1], 1 }

</bundles_post_ra>
